<compile_context>
chip_gen: v7x
topology: tpu7x:2x2x1
jax: 0.10.0
libtpu: 0.0.40
codegen_flags: <defaults>
</compile_context>

<pallas_src>
import functools

import numpy as np

import jax
import jax.numpy as jnp
from jax.experimental import pallas as pl
from jax.experimental.pallas import tpu as pltpu

_MIB = 1024 * 1024


def _vmem_budget_and_limit():
    """Generation-aware VMEM budget for one double-buffered block set."""
    try:
        cap = int(pltpu.get_tpu_info().vmem_capacity_bytes)
    except Exception:  # unknown target / interpret mode
        cap = 64 * _MIB
    if cap >= 96 * _MIB:      # v5e / v6e: 128 MiB physical VMEM
        budget = 24 * _MIB
    else:                     # v7x: 64 MiB per TensorCore -> clamp harder
        budget = 18 * _MIB
    limit = min(cap * 3 // 4, budget + 16 * _MIB)   # headroom for temporaries
    return budget, int(limit)


def _choose_tiles(B, L, C, D, x_itemsize, out_itemsize, compute_itemsize, budget):
    """Pick (batch tile Bt, length tile Lt): largest block set under budget."""
    c_pad = max(C, 128)  # tiny channel dim is lane-padded inside the kernel

    def block_bytes(bt, lt):
        in_blk = 2 * bt * L * C * x_itemsize              # double-buffered x block
        out_blk = 2 * bt * lt * D * out_itemsize          # double-buffered out block
        temps = bt * lt * (3 * c_pad * compute_itemsize   # xc / xp / xn windows
                           + D * 4                        # f32 accumulator
                           + D * out_itemsize)            # cast result before store
        return in_blk + out_blk + temps

    bt_cands = [d for d in range(1, B + 1) if B % d == 0]
    # Lt must be the full L or a multiple-of-8 divisor of L (block-shape rule).
    lt_cands = [L] + [d for d in range(8, L, 8) if L % d == 0]

    fitting = [(bt, lt) for bt in bt_cands for lt in lt_cands
               if block_bytes(bt, lt) <= budget]
    if not fitting:
        # Degenerate huge-L / tiny-VMEM case: smallest legal block.
        return 1, min(lt_cands, key=lambda lt: block_bytes(1, lt))

    def steps(bt, lt):
        return (B // bt) * (L // lt)

    # Keep >= 2 grid steps when shapes allow (feeds both v7x TensorCores),
    # then take the LARGEST fitting block: the kernel is HBM-write bound, so
    # bigger DMAs and fewer ~0.35us grid-step overheads win.
    multi = [c for c in fitting if steps(*c) >= 2]
    cands = multi or fitting
    return max(cands, key=lambda c: (block_bytes(*c), c[1], c[0]))


def token_embedding_kernel(x_ref, w_ref, o_ref, *, lt, compute_dtype):
    # x_ref: (Bt, L, C)   full-length input rows for this batch tile
    # w_ref: (3, C, D)    tap weights: k=0 -> x[t-1], k=1 -> x[t], k=2 -> x[t+1]
    # o_ref: (Bt, Lt, D)  output tile for length window `l`
    bt, L, C = x_ref.shape
    D = o_ref.shape[-1]
    l = pl.program_id(1)

    start = l * lt
    if lt % 8 == 0:
        start = pl.multiple_of(start, 8)   # sublane-aligned window start

    # Center window and its +-1 circular neighbours along the per-batch time
    # axis.  The shift happens on axis 1 of the (Bt, L, C) block, so the wrap
    # never leaks across batch rows; the single edge rows use modular indices
    # so the wrap is correct for the first/last length tile too.
    xc = x_ref[:, pl.ds(start, lt), :]                       # rows t
    prev_row = x_ref[:, pl.ds((start + L - 1) % L, 1), :]    # row (start-1) % L
    next_row = x_ref[:, pl.ds((start + lt) % L, 1), :]       # row (start+lt) % L
    if lt == 1:
        xp, xn = prev_row, next_row
    else:
        xp = jnp.concatenate([prev_row, xc[:, : lt - 1, :]], axis=1)  # rows t-1
        xn = jnp.concatenate([xc[:, 1:, :], next_row], axis=1)        # rows t+1

    def tap(xw, k):
        a = xw.reshape(bt * lt, C).astype(compute_dtype)
        return jnp.dot(a, w_ref[k], preferred_element_type=jnp.float32)

    acc = tap(xc, 1) + tap(xp, 0) + tap(xn, 2)               # f32 accumulation
    o_ref[...] = acc.reshape(bt, lt, D).astype(o_ref.dtype)


@functools.partial(jax.jit, static_argnames=("compute_dtype", "out_dtype"))
def token_embedding(x, w_kcd, *, compute_dtype=jnp.bfloat16,
                    out_dtype=jnp.bfloat16):
    """x: (B, L, C_in), w_kcd: (3, C_in, d_model) -> (B, L, d_model)."""
    B, L, C = x.shape
    K, Cw, D = w_kcd.shape
    assert K == 3 and Cw == C

    w = w_kcd.astype(compute_dtype)               # tiny, one-off cast
    x_itemsize = x.dtype.itemsize
    out_itemsize = np.dtype(out_dtype).itemsize
    compute_itemsize = np.dtype(compute_dtype).itemsize

    budget, vmem_limit = _vmem_budget_and_limit()
    bt, lt = _choose_tiles(B, L, C, D, x_itemsize, out_itemsize,
                           compute_itemsize, budget)
    grid = (B // bt, L // lt)

    kernel = functools.partial(token_embedding_kernel, lt=lt,
                               compute_dtype=compute_dtype)
    return pl.pallas_call(
        kernel,
        out_shape=jax.ShapeDtypeStruct((B, L, D), out_dtype),
        grid_spec=pltpu.PrefetchScalarGridSpec(
            num_scalar_prefetch=0,
            grid=grid,
            in_specs=[
                # Full-length input block; block index is constant along the
                # inner l axis, so it is DMA'd once per batch tile.
                pl.BlockSpec((bt, L, C), lambda b, l: (b, 0, 0)),
                # Tiny constant weight block (a few KiB; the default double
                # buffer is negligible, so no pipeline_mode override).
                pl.BlockSpec((3, C, D), lambda b, l: (0, 0, 0)),
            ],
            out_specs=pl.BlockSpec((bt, lt, D), lambda b, l: (b, l, 0)),
        ),
        compiler_params=pltpu.CompilerParams(
            dimension_semantics=("parallel", "parallel"),
            vmem_limit_bytes=vmem_limit,
        ),
        cost_estimate=pl.CostEstimate(
            flops=2 * B * L * 3 * C * D,
            transcendentals=0,
            bytes_accessed=B * L * (C * x_itemsize + D * out_itemsize)
            + 3 * C * D * compute_itemsize,
        ),
    )(x, w)


def reference_token_embedding(x, w_torch):
    """Independent reference: circular pad + conv (matches PyTorch semantics).

    x: (B, L, C), w_torch: (d_model, C_in, 3)  (torch Conv1d weight layout).
    """
    xc = jnp.transpose(x, (0, 2, 1))                          # (B, C, L)
    xp = jnp.pad(xc, ((0, 0), (0, 0), (1, 1)), mode="wrap")   # circular padding=1
    y = jax.lax.conv_general_dilated(
        xp, w_torch, window_strides=(1,), padding="VALID",
        dimension_numbers=("NCH", "OIH", "NCH"),
        precision=jax.lax.Precision.HIGHEST,
    )                                                          # (B, D, L)
    return jnp.transpose(y, (0, 2, 1))                         # (B, L, D)


if __name__ == "__main__":
    # Small shapes consistent with the module: x is (batch, seq_len, c_in).
    B, L, c_in, d_model = 2, 16, 4, 32

    key = jax.random.PRNGKey(0)
    kx, kw = jax.random.split(key)

    x = jax.random.normal(kx, (B, L, c_in), dtype=jnp.float32)

    # Kaiming-normal init (mode='fan_in', nonlinearity='leaky_relu', slope=.01)
    # torch Conv1d weight shape: (d_model, c_in, 3); fan_in = c_in * 3.
    negative_slope = 0.01
    gain = (2.0 / (1.0 + negative_slope ** 2)) ** 0.5
    std = gain / ((c_in * 3) ** 0.5)
    w_torch = std * jax.random.normal(kw, (d_model, c_in, 3), dtype=jnp.float32)

    # Kernel-friendly weight layout: (K, C_in, d_model).
    w_kcd = jnp.transpose(w_torch, (2, 1, 0))

    ref = reference_token_embedding(x, w_torch)

    # High-precision path: verifies taps / circular shifts / L-tiling tightly.
    out_f32 = jax.block_until_ready(
        token_embedding(x, w_kcd, compute_dtype=jnp.float32,
                        out_dtype=jnp.float32))
    assert out_f32.shape == (B, L, d_model)
    assert jnp.allclose(out_f32, ref, atol=1e-3, rtol=1e-3), "f32 path mismatch"

    # Default path: bf16 MXU matmuls (f32 accumulation) + bf16 output store.
    out = jax.block_until_ready(token_embedding(x, w_kcd))
    assert out.shape == (B, L, d_model)
    assert out.dtype == jnp.bfloat16
    assert jnp.allclose(out.astype(jnp.float32), ref, atol=1e-1, rtol=5e-2), \
        "bf16 path mismatch"

    print("KERNEL_OK")
</pallas_src>

<mosaic_0001>
module attributes {stable_mosaic.version = 11 : i64} {
  func.func @token_embedding_kernel(%arg0: i32, %arg1: i32, %arg2: memref<2x16x4xf32, #tpu.memory_space<vmem>>, %arg3: memref<3x4x32xf32, #tpu.memory_space<vmem>>, %arg4: memref<2x8x32xf32, #tpu.memory_space<vmem>>) attributes {dimension_semantics = [#tpu.dimension_semantics<parallel>, #tpu.dimension_semantics<parallel>], iteration_bounds = array<i64: 1, 2>, scalar_prefetch = 0 : i64, scratch_operands = 0 : i64, tpu.core_type = #tpu.core_type<tc>, window_params = [{transform_indices = @transform_0, window_bounds = array<i64: 2, 16, 4>}, {pipeline_mode = #tpu.pipeline_mode<synchronous>, transform_indices = @transform_1, window_bounds = array<i64: 3, 4, 32>}, {transform_indices = @transform_2, window_bounds = array<i64: 2, 8, 32>}]} {
    %c8_i32 = arith.constant 8 : i32
    %0 = arith.muli %arg1, %c8_i32 : i32
    %1 = tpu.assume_multiple %0, 8 : i32
    %c0 = arith.constant 0 : index
    %2 = arith.index_cast %1 : i32 to index
    %c0_0 = arith.constant 0 : index
    %3 = vector.load %arg2[%c0, %2, %c0_0] : memref<2x16x4xf32, #tpu.memory_space<vmem>>, vector<2x8x4xf32>
    %c16_i32 = arith.constant 16 : i32
    %4 = arith.addi %1, %c16_i32 : i32
    %c1_i32 = arith.constant 1 : i32
    %5 = arith.subi %4, %c1_i32 : i32
    %c16_i32_1 = arith.constant 16 : i32
    %c0_i32 = arith.constant 0 : i32
    %6 = arith.cmpi eq, %c16_i32_1, %c0_i32 : i32
    %c1_i32_2 = arith.constant 1 : i32
    %7 = arith.select %6, %c1_i32_2, %c16_i32_1 : i32
    %8 = arith.remsi %5, %7 : i32
    %c0_i32_3 = arith.constant 0 : i32
    %9 = arith.cmpi ne, %8, %c0_i32_3 : i32
    %c0_i32_4 = arith.constant 0 : i32
    %10 = arith.cmpi slt, %8, %c0_i32_4 : i32
    %c0_i32_5 = arith.constant 0 : i32
    %11 = arith.cmpi slt, %7, %c0_i32_5 : i32
    %12 = arith.xori %10, %11 : i1
    %13 = arith.andi %12, %9 : i1
    %14 = arith.addi %8, %7 : i32
    %15 = arith.select %13, %14, %8 : i32
    %c0_6 = arith.constant 0 : index
    %16 = arith.index_cast %15 : i32 to index
    %c0_7 = arith.constant 0 : index
    %17 = vector.load %arg2[%c0_6, %16, %c0_7] : memref<2x16x4xf32, #tpu.memory_space<vmem>>, vector<2x1x4xf32>
    %c8_i32_8 = arith.constant 8 : i32
    %18 = arith.addi %1, %c8_i32_8 : i32
    %c16_i32_9 = arith.constant 16 : i32
    %c0_i32_10 = arith.constant 0 : i32
    %19 = arith.cmpi eq, %c16_i32_9, %c0_i32_10 : i32
    %c1_i32_11 = arith.constant 1 : i32
    %20 = arith.select %19, %c1_i32_11, %c16_i32_9 : i32
    %21 = arith.remsi %18, %20 : i32
    %c0_i32_12 = arith.constant 0 : i32
    %22 = arith.cmpi ne, %21, %c0_i32_12 : i32
    %c0_i32_13 = arith.constant 0 : i32
    %23 = arith.cmpi slt, %21, %c0_i32_13 : i32
    %c0_i32_14 = arith.constant 0 : i32
    %24 = arith.cmpi slt, %20, %c0_i32_14 : i32
    %25 = arith.xori %23, %24 : i1
    %26 = arith.andi %25, %22 : i1
    %27 = arith.addi %21, %20 : i32
    %28 = arith.select %26, %27, %21 : i32
    %c0_15 = arith.constant 0 : index
    %29 = arith.index_cast %28 : i32 to index
    %c0_16 = arith.constant 0 : index
    %30 = vector.load %arg2[%c0_15, %29, %c0_16] : memref<2x16x4xf32, #tpu.memory_space<vmem>>, vector<2x1x4xf32>
    %31 = vector.extract_strided_slice %3 {offsets = [0, 0, 0], sizes = [2, 7, 4], strides = [1, 1, 1]} : vector<2x8x4xf32> to vector<2x7x4xf32>
    %32 = tpu.concatenate %17, %31 in 1 : vector<2x1x4xf32>, vector<2x7x4xf32> -> vector<2x8x4xf32>
    %33 = vector.extract_strided_slice %3 {offsets = [0, 1, 0], sizes = [2, 7, 4], strides = [1, 1, 1]} : vector<2x8x4xf32> to vector<2x7x4xf32>
    %34 = tpu.concatenate %33, %30 in 1 : vector<2x7x4xf32>, vector<2x1x4xf32> -> vector<2x8x4xf32>
    %35 = vector.shape_cast %3 : vector<2x8x4xf32> to vector<16x4xf32>
    %c1 = arith.constant 1 : index
    %c0_17 = arith.constant 0 : index
    %c0_18 = arith.constant 0 : index
    %36 = vector.load %arg3[%c1, %c0_17, %c0_18] : memref<3x4x32xf32, #tpu.memory_space<vmem>>, vector<1x4x32xf32>
    %37 = vector.shape_cast %36 : vector<1x4x32xf32> to vector<4x32xf32>
    %cst = arith.constant dense<0.000000e+00> : vector<16x32xf32>
    %38 = tpu.matmul %35, %37, %cst {dimension_numbers = #tpu.dot_dimension_numbers<[1], [0], [0], [1], [0, 0, 1, 1], [], []>} : vector<16x4xf32>, vector<4x32xf32>, vector<16x32xf32> -> vector<16x32xf32>
    %39 = vector.shape_cast %32 : vector<2x8x4xf32> to vector<16x4xf32>
    %c0_19 = arith.constant 0 : index
    %c0_20 = arith.constant 0 : index
    %c0_21 = arith.constant 0 : index
    %40 = vector.load %arg3[%c0_19, %c0_20, %c0_21] : memref<3x4x32xf32, #tpu.memory_space<vmem>>, vector<1x4x32xf32>
    %41 = vector.shape_cast %40 : vector<1x4x32xf32> to vector<4x32xf32>
    %cst_22 = arith.constant dense<0.000000e+00> : vector<16x32xf32>
    %42 = tpu.matmul %39, %41, %cst_22 {dimension_numbers = #tpu.dot_dimension_numbers<[1], [0], [0], [1], [0, 0, 1, 1], [], []>} : vector<16x4xf32>, vector<4x32xf32>, vector<16x32xf32> -> vector<16x32xf32>
    %43 = arith.addf %38, %42 : vector<16x32xf32>
    %44 = vector.shape_cast %34 : vector<2x8x4xf32> to vector<16x4xf32>
    %c2 = arith.constant 2 : index
    %c0_23 = arith.constant 0 : index
    %c0_24 = arith.constant 0 : index
    %45 = vector.load %arg3[%c2, %c0_23, %c0_24] : memref<3x4x32xf32, #tpu.memory_space<vmem>>, vector<1x4x32xf32>
    %46 = vector.shape_cast %45 : vector<1x4x32xf32> to vector<4x32xf32>
    %cst_25 = arith.constant dense<0.000000e+00> : vector<16x32xf32>
    %47 = tpu.matmul %44, %46, %cst_25 {dimension_numbers = #tpu.dot_dimension_numbers<[1], [0], [0], [1], [0, 0, 1, 1], [], []>} : vector<16x4xf32>, vector<4x32xf32>, vector<16x32xf32> -> vector<16x32xf32>
    %48 = arith.addf %43, %47 : vector<16x32xf32>
    %49 = vector.shape_cast %48 : vector<16x32xf32> to vector<2x8x32xf32>
    %c0_26 = arith.constant 0 : index
    %c0_27 = arith.constant 0 : index
    %c0_28 = arith.constant 0 : index
    %50 = vector.load %arg4[%c0_26, %c0_27, %c0_28] : memref<2x8x32xf32, #tpu.memory_space<vmem>>, vector<2x8x32xf32>
    tpu.vector_store %arg4[%c0_26, %c0_27, %c0_28], %49 {strides = array<i32>} : memref<2x8x32xf32, #tpu.memory_space<vmem>>, vector<2x8x32xf32>,
    return
  }
  func.func @transform_0(%arg0: i32, %arg1: i32) -> (i32, i32, i32) {
    %c0_i32 = arith.constant 0 : i32
    %c0_i32_0 = arith.constant 0 : i32
    %c0_i32_1 = arith.constant 0 : i32
    return %arg0, %c0_i32, %c0_i32_0 : i32, i32, i32
  }
  func.func @transform_1(%arg0: i32, %arg1: i32) -> (i32, i32, i32) {
    %c0_i32 = arith.constant 0 : i32
    %c0_i32_0 = arith.constant 0 : i32
    %c0_i32_1 = arith.constant 0 : i32
    %c0_i32_2 = arith.constant 0 : i32
    return %c0_i32, %c0_i32_0, %c0_i32_1 : i32, i32, i32
  }
  func.func @transform_2(%arg0: i32, %arg1: i32) -> (i32, i32, i32) {
    %c0_i32 = arith.constant 0 : i32
    %c0_i32_0 = arith.constant 0 : i32
    return %arg0, %arg1, %c0_i32 : i32, i32, i32
  }
}

</mosaic_0001>

<bundles_post_ra>
// kernel: token_embedding.1
= control target key start
LH: loop header
LB: loop body
LE: loop exit
PB: predicated region body
PF: predicated region fallthrough
CT: control target
= control target key end

     0   :  { %7 = vsyncpa [#allocation3], 0  ;;  %s931_s0 = inlined_call_operand.vmem [shape: f32[2,16,4], index: 0, kind: input, shape index: {}]   ;;  %s932_s1 = inlined_call_operand.vmem [shape: f32[3,4,32], index: 1, kind: input, shape index: {}]   ;;  %s933_s2 = inlined_call_operand.hbm [shape: f32[2,16,32], index: 2, kind: output, shape index: {}]  }
   0x1   :  { %9 = vsyncpa [#allocation3 + $0x1], 0  ;;  %s790_s9 = smov 0   ;;  %s792_s10 = smov 0  }
   0x2   :  { %s794_s11 = smov 0   ;;  %s796_s12 = smov 0  }
   0x3   :  { %s798_s13 = smov 0   ;;  %s800_s14 = smov 0  }
   0x4 LB: > { %s577_s15 = sadd.s32 4294967295, %s769_s14   ;;  %s578_s16 = sadd.s32 4294967294, %s769_s14   ;;  %s769_s14 = sphi %s800_s14, %s15_s14   ;;  %s765_s13 = sphi %s798_s13, %s940_s13   ;;  %s761_s12 = sphi %s796_s12, %s939_s12   ;;  %s757_s11 = sphi %s794_s11, %s938_s11   ;;  %s753_s10 = sphi %s792_s10, %s937_s10   ;;  %s749_s9 = sphi %s790_s9, %s936_s9  }
   0x5   : > { %s24_s17 = sadd.s32 1, %s765_s13  ;;  %s83_s18 = sadd.s32 1, %s757_s11 }
   0x6   : > { %p25_p0 = scmp.ge.s32.totalorder %s24_s17, 2  ;;  %p93_p1 = scmp.ne.s32.totalorder %s757_s11, %s753_s10 }
   0x7   : > { %p94_p2 = scmp.eq.s32.totalorder %s577_s15, 1  ;;  %p99_p3 = scmp.ne.s32.totalorder %s753_s10, %s749_s9 }
   0x8   : > { %s942_s17 = smov (%p25_p0, %s24_s17), 0  ;;  %p100_p5 = scmp.eq.s32.totalorder %s578_s16, 1 }
   0x9   : > { %p830_p4 = por %p94_p2, %p93_p1  ;;  %s79_s20 = ssub.s32 %s765_s13, %s942_s17 }
   0xa   : > { %p581_p6 = scmp.ge.s32.totalorder %s769_s14, 1  ;;  %p81_p7 = scmp.eq.s32.totalorder %s79_s20, 0 }
   0xb   : > { %p837_p8 = por %p100_p5, %p99_p3  ;;  %p131_p9 = scmp.lt.s32.totalorder %s769_s14, 3 }
   0xc   : > { %s843_s22 = scalar_select %p81_p7, %s757_s11, %s83_s18  }
   0xd   : > { %p132_p10 = pnand %p581_p6, %p131_p9 }
   0xe   : > { %v590_v0 = vld [vmem:[%s932_s1 + $0x4] sm:$0xf] (!%p132_p10)  ;;  %vm230_vm0 = vcmask (!%p132_p10), 1043456   ;;  %s583_s25 = sshll.u32 (!%p132_p10), %s761_s12, 3  ;;  %vm223_vm1 = vcmask (!%p132_p10), 31744   ;;  %vm204_vm2 = vcmask (!%p132_p10), 1040384  }
   0xf   : > { %135 = sbr.rel (%p132_p10) target bundleno = 264 (0x108), region = 28  ;;  %619 = vmatprep.subr.msk.mxu0 (!%p132_p10), %vm230_vm0, %v590_v0  ;;  %s163_s28 = scalar_lea.vmem (!%p132_p10), %s931_s0, %s583_s25  ;;  %v597_v1 = vld [vmem:[%s932_s1 + $0x8] sm:$0xf] (!%p132_p10)  ;;  %v222_v2 = vld [vmem:[%s932_s1] sm:$0xf] (!%p132_p10)  ;;  %vm217_vm3 = vcmask (!%p132_p10), 1046528  }
  0x10   : > { %s166_s29 = sadd.s32 (!%p132_p10), 15, %s583_s25  ;;  %620 = vmatpush3.msk.msra.mxu0 (!%p132_p10), %vm230_vm0, %v590_v0  ;;  %v164_v3 = vld [vmem:[%s163_s28] sm:$0xff] (!%p132_p10)  ;;  %v165_v4 = vld [vmem:[%s163_s28 + $0x10] sm:$0xff] (!%p132_p10)  ;;  %614 = vmatprep.subr.msk.mxu1 (!%p132_p10), %vm230_vm0, %v222_v2  ;;  %s182_s8 = sadd.s32 (!%p132_p10), 8, %s583_s25  ;;  %vm479_vm4 = vcmask (!%p132_p10), 261120  }
  0x11   : > { %s168_s6 = ssub.s32 (!%p132_p10), 0, %s166_s29  ;;  %621 = vmatprep.mubr.msk.f32.mxu0 (!%p132_p10), %vm223_vm1, %v164_v3  ;;  %624 = vmatprep.subr.msk.mxu0 (!%p132_p10), %vm230_vm0, %v597_v1  ;;  %p183_p11 = scmp.lt.s32.totalorder (!%p132_p10), %s182_s8, 0  ;;  %v200_v5 = vrot.slane (!%p132_p10), %v164_v3, 7  ;;  %v201_v6 = vrot.slane (!%p132_p10), %v165_v4, 7  ;;  %v207_v7 = vrot.slane (!%p132_p10), %v164_v3, 1  ;;  %v208_v8 = vrot.slane (!%p132_p10), %v165_v4, 1 }
  0x12   : > { %s584_s7 = smin.u32 (!%p132_p10), %s168_s6, %s166_s29  ;;  %622 = vmatmul.mubr.msk.f32.vlgmr.msra.gmra.mrb[0].mxu0 (!%p132_p10), %vm223_vm1, %v165_v4  ;;  %615 = vmatpush3.msk.msra.mxu1 (!%p132_p10), %vm230_vm0, %v222_v2  ;;  %s184_s16 = ssub.s32 (!%p132_p10), 0, %s182_s8 }
  0x13   : > { %s170_s15 = sand.u32 (!%p132_p10), 15, %s584_s7   ;;  %625 = vmatpush3.msk.msra.mxu0 (!%p132_p10), %vm230_vm0, %v597_v1  ;;  %p167_p12 = scmp.lt.s32.totalorder (!%p132_p10), %s166_s29, 0 }
  0x14   : > { %s587_s18 = smin.u32 (!%p132_p10), %s184_s16, %s182_s8  ;;  %s171_s20 = ssub.s32 (!%p132_p10), 0, %s170_s15 }
  0x15   : > { %s186_s23 = sand.u32 (!%p132_p10), 15, %s587_s18   ;;  %s151_s5 = sand.u32 (!%p132_p10), 1, %s753_s10  }
  0x16   : > { %s187_s24 = ssub.s32 0, %s186_s23  ;;  %s946_s20 = smov (!%p167_p12, %s171_s20), %s170_s15 }
  0x17   : > { %s944_s24 = smov (!%p183_p11, %s187_s24), %s186_s23  ;;  %p586_p0 = scmp.lt.s32.totalorder %s946_s20, 0 }
  0x18   : > { %p589_p13 = scmp.lt.s32.totalorder %s944_s24, 0  ;;  %s193_s25 = sadd.s32 16, %s944_s24 }
  0x19   : > { %s177_s26 = sadd.s32 16, %s946_s20  ;;  %s582_s6 = sshll.u32 %s151_s5, 4 }
  0x1a   : > { %s948_s25 = smov (!%p589_p13, %s193_s25), %s944_s24  ;;  %s950_s26 = smov (!%p586_p0, %s177_s26), %s946_s20 }
  0x1b   : > { %s195_s29 = scalar_lea.vmem %s931_s0, %s948_s25  ;;  %s179_s4 = scalar_lea.vmem %s931_s0, %s950_s26 }
  0x1c   : > { %v196_v9 = vld [vmem:[%s195_s29] sm:$0x1]  ;;  %v197_v10 = vld [vmem:[%s195_s29 + $0x10] sm:$0x1]  ;;  %s153_s7 = scalar_lea.vmem [#allocation2], %s582_s6  ;;  %s602_s15 = sshll.u32 %s761_s12, 7 }
  0x1d   : > { %v180_v11 = vld [vmem:[%s179_s4] sm:$0x1]  ;;  %v181_v12 = vld [vmem:[%s179_s4 + $0x10] sm:$0x1]  ;;  %v213_v13 = vrot.slane %v196_v9, 1  ;;  %v214_v14 = vrot.slane %v197_v10, 1  ;;  %s883_s20 = scalar_lea.hbm %s933_s2, %s602_s15 }
  0x1e   : > { %v205_v15 = vsel %vm204_vm2, %v180_v11, %v200_v5  ;;  %v206_v16 = vsel %vm204_vm2, %v181_v12, %v201_v6  ;;  %s498_s8 = sshll.u32 %s153_s7, 4  ;;  %s885_s12 = scalar_lea.sflag [#allocation3], %s151_s5  ;;  %s878_s8 = int_to_ptr.vmem [resolvable:$true] %s498_s8 }
  0x1f   : > { %616 = vmatprep.mubr.msk.f32.mxu1 %vm223_vm1, %v205_v15  ;;  %v218_v17 = vsel %vm217_vm3, %v207_v7, %v213_v13  ;;  %v219_v18 = vsel %vm217_vm3, %v208_v8, %v214_v14  ;;  %s691_s23 = scalar_lea.vmem %s878_s8, 256  ;;  %s771_s24 = smov [#allocation2]  }
  0x20   : > { %617 = vmatmul.mubr.msk.f32.vlgmr.msra.gmra.mrb[0].mxu1 %vm223_vm1, %v206_v16  ;;  %626 = vmatprep.mubr.msk.f32.mxu0 %vm223_vm1, %v218_v17  ;;  %p692_p1 = scmp.ne.s32.totalorder %s878_s8, %s691_s23  ;;  %s695_s25 = sshll.u32 %s771_s24, 4  ;;  %s696_s25 = int_to_ptr.vmem [resolvable:$false] %s695_s25 }
  0x21   : > { %627 = vmatmul.mubr.msk.f32.vlgmr.msra.gmra.mrb[0].mxu0 %vm223_vm1, %v219_v18  ;;  %s697_s26 = scalar_lea.vmem %s696_s25, 512  ;;  %p698_p5 = scmp.lt.s32.totalorder %s878_s8, %s696_s25 }
  0x22   : > { %p693_p2 = pnand %p692_p1, %p830_p4  ;;  %p699_p6 = scmp.lt.s32.totalorder %s697_s26, %s691_s23 }
  0x24   : > { %p694_p3 = pneg %p693_p2  ;;  %p700_p7 = por %p699_p6, %p698_p5 }
  0x26   : > { %p701_p9 = pnand %p700_p7, %p694_p3 }
  0xf3   : > { %v618_v19 = vpop.f32.mrb[0].mxu1 }
  0xf4   : > { %v300_v20 = vpop.f32.mrb[1].mxu1  ;;  %v628_v21 = vpop.f32.mrb[0].mxu0 }
  0xf5   : > { %v629_v22 = vadd.f32 %v628_v21, %v618_v19  ;;  %v468_v23 = vpop.f32.mrb[1].mxu0 }
  0xf6   : > { %v630_v24 = vadd.f32 %v468_v23, %v300_v20 }
  0xf7   : > { %481 = vst.msk [vmem:[%s153_s7 + $0x8] sm:$0xff] %vm479_vm4, %v629_v22 }
  0xf8   : > { %480 = vst.msk [vmem:[%s153_s7] sm:$0xff] %vm479_vm4, %v630_v24 }
  0xf9   : > { %704 = shalt.err (!%p701_p9)
}
  0xfa   : > { %s705_s27 = scalar_lea.hbm %s883_s20, 256  ;;  %s709_s30 = scalar_lea.hbm %s933_s2, 512 }
  0xfb   : > { %p706_p10 = scmp.ne.s32.totalorder %s883_s20, %s705_s27  ;;  %p710_p13 = scmp.lt.u32.totalorder %s883_s20, %s933_s2 }
  0xfc   : > { %p711_p0 = scmp.lt.u32.totalorder %s709_s30, %s705_s27  ;;  %p713_p2 = scmp.lt.u32.totalorder %s705_s27, %s883_s20 }
  0xfd   : > { %p707_p11 = pnand %p706_p10, %p830_p4 }
  0xfe   : > { %p712_p1 = por %p711_p0, %p710_p13 }
  0xff   : > { %p708_p12 = pneg %p707_p11 }
 0x100   : > { %p714_p3 = por %p713_p2, %p712_p1 }
 0x102   : > { %p715_p5 = pnand %p714_p3, %p708_p12 }
 0x104   : > { %718 = shalt.err (!%p715_p5)
}
 0x105   : > { %s772_s5 = smov 128   ;;  %s773_s6 = smov 256  }
 0x106   : > { %s774_s7 = smov 8  }
 0x107   : > { %633 = dma.vmem_to_hbm [thread:$0]  (%p830_p4), %s878_s8, 256, %s883_s20, %s885_s12, %s772_s5, %s773_s6, %s774_s7  }
 0x108 PF: > { %p639_p6 = scmp.ge.s32.totalorder %s769_s14, 2  ;;  %s513_s15 = sand.u32 1, %s749_s9  }
 0x109   : > { %s514_s16 = scalar_lea.sflag [#allocation3], %s513_s15 }
 0x10a   : > { %p636_p7 = pnand %p639_p6, %p837_p8 }
 0x10c   : > { %744 = dma.done.wait (!%p636_p7), %s514_s16, 256  }
 0x10d   : > { %746 = vsyncadd (!%p636_p7), %s514_s16, 4294967040  ;;  %s15_s14 = sadd.s32 1, %s769_s14   ;;  %s936_s9 = smov %s753_s10 }
 0x10e   : > { %p12_p9 = scmp.ge.s32.totalorder %s15_s14, 4   ;;  %s937_s10 = smov %s757_s11 }
 0x10f   : > { %s938_s11 = smov %s843_s22  ;;  %s939_s12 = smov %s765_s13 }
 0x110   : > { %s940_s13 = smov %s942_s17  ;;  %14 = sbr.rel (!%p12_p9) target bundleno = 4 (0x4), region = 68 }
 0x117   :  { %519 = vsyncpa [#allocation3], 1 }
 0x118   :  { %521 = vsyncpa [#allocation3 + $0x1], 1 }

</bundles_post_ra>
